<compile_context>
chip_gen: v7x
topology: tpu7x:2x2x1
jax: 0.10.0
libtpu: 0.0.40
codegen_flags: <defaults>
</compile_context>

<pallas_src>
import functools

import jax
import jax.numpy as jnp
from jax.experimental import pallas as pl
from jax.experimental.pallas import tpu as pltpu

LAMBDA_MIN = 1.0
LAMBDA_MAX = 20.0

_LANES = 128
_MAX_BLOCK_ROWS = 2048       # 2048 x 128 x 4 B = 1 MiB per f32 input block
_MIN_PALLAS_ELEMS = 1024     # below this a kernel launch costs more than it saves


def _round_up(x, m):
    return ((x + m - 1) // m) * m


def _ssd_kernel(a_ref, b_ref, acc_out_ref, *, rows, block_rows, inner_steps, needs_mask):
    """Accumulates sum((a - b)^2) of this core's row range into an (8, 128) output block."""
    i = pl.program_id(1)

    @pl.when(i == 0)
    def _():
        acc_out_ref[...] = jnp.zeros_like(acc_out_ref)

    # Widen in-register on the VPU; inputs stay in their native dtype in HBM.
    d = a_ref[...].astype(jnp.float32) - b_ref[...].astype(jnp.float32)
    sq = d * d

    def accumulate(vals):
        # Reduce (block_rows, 128) -> (8, 128) with VALU adds only (reshape groups whole
        # (8, 128) tiles, so it does not cross tile boundaries); no per-step XLU reduce.
        acc_out_ref[...] += jnp.sum(vals.reshape(-1, 8, _LANES), axis=0)

    if not needs_mask:
        accumulate(sq)
    else:
        c = pl.program_id(0)
        logical_block = c * inner_steps + i
        full_blocks = rows // block_rows   # blocks containing only valid rows (static)

        @pl.when(logical_block < full_blocks)
        def _():
            accumulate(sq)

        @pl.when(logical_block >= full_blocks)
        def _():
            # Partial tail block (Pallas-padded rows) or a duplicated/clamped block from the
            # uneven two-core split: zero out every row past the true row count.
            row = jax.lax.broadcasted_iota(jnp.int32, sq.shape, 0)
            valid = (logical_block * block_rows + row) < rows
            accumulate(jnp.where(valid, sq, jnp.float32(0.0)))


def _sum_squared_diff(a, b):
    """||a - b||_F^2.  Pallas reduction for large tensors, fused XLA for tiny ones."""
    assert a.shape == b.shape
    n = a.size
    if n < _MIN_PALLAS_ELEMS:
        d = a.astype(jnp.float32) - b.astype(jnp.float32)
        return jnp.sum(d * d)

    a_flat = jnp.ravel(a)    # bitcast for contiguous input; no dtype cast in the wrapper
    b_flat = jnp.ravel(b)
    if n % _LANES != 0:
        # Rare path (element count not a multiple of 128): zero-pad both operands so the
        # padded lanes contribute exactly zero to sum((a-b)^2).
        pad = _round_up(n, _LANES) - n
        a_flat = jnp.pad(a_flat, (0, pad))
        b_flat = jnp.pad(b_flat, (0, pad))

    rows = a_flat.size // _LANES
    block_rows = min(_MAX_BLOCK_ROWS, _round_up(rows, 8))
    total_steps = pl.cdiv(rows, block_rows)

    # Split the reduction across (up to) two TensorCores; on 1-TC chips the leading
    # "parallel" axis simply iterates serially.
    num_parallel = 2 if total_steps >= 2 else 1
    inner_steps = pl.cdiv(total_steps, num_parallel)

    needs_clamp = num_parallel * inner_steps > total_steps   # uneven split -> dup blocks
    needs_mask = needs_clamp or (rows % block_rows != 0)

    if needs_clamp:
        # Clamp duplicated logical blocks onto the last real block (keeps the DMA
        # in-bounds); the kernel masks their contribution to zero.
        def in_map(c, i):
            return (jnp.minimum(c * inner_steps + i, total_steps - 1), 0)
    else:
        def in_map(c, i):
            return (c * inner_steps + i, 0)

    a2d = a_flat.reshape(rows, _LANES)
    b2d = b_flat.reshape(rows, _LANES)

    kernel = functools.partial(
        _ssd_kernel, rows=rows, block_rows=block_rows,
        inner_steps=inner_steps, needs_mask=needs_mask)

    itemsize = a.dtype.itemsize
    # Each core accumulates into its own lane-dense (8, 128) output slab (full unmasked
    # vector stores); the tiny final reduction happens in the wrapper.
    partials = pl.pallas_call(
        kernel,
        out_shape=jax.ShapeDtypeStruct((num_parallel * 8, _LANES), jnp.float32),
        grid_spec=pltpu.PrefetchScalarGridSpec(
            num_scalar_prefetch=0,
            grid=(num_parallel, inner_steps),
            in_specs=[pl.BlockSpec((block_rows, _LANES), in_map),
                      pl.BlockSpec((block_rows, _LANES), in_map)],
            out_specs=pl.BlockSpec((8, _LANES), lambda c, i: (c, 0)),
        ),
        compiler_params=pltpu.CompilerParams(
            dimension_semantics=("parallel", "arbitrary")),
        cost_estimate=pl.CostEstimate(
            flops=3 * n,
            transcendentals=0,
            bytes_accessed=2 * n * itemsize + num_parallel * 8 * _LANES * 4),
    )(a2d, b2d)
    return jnp.sum(partials)


@functools.partial(jax.jit, static_argnames=("lambda_min", "lambda_max"))
def jacobian_clamping_loss(gz, gz_prime, z, z_prime,
                           lambda_min=LAMBDA_MIN, lambda_max=LAMBDA_MAX):
    """JAX/Pallas equivalent of JacobianClampingLoss.forward."""
    ssd_g = _sum_squared_diff(gz, gz_prime)   # ||gz - gz'||^2  (Pallas kernel)
    ssd_z = _sum_squared_diff(z, z_prime)     # ||z  - z' ||^2  (tiny -> plain XLA)

    # Matches the PyTorch reference: q is inf/NaN if z == z_prime.
    q = jnp.sqrt(ssd_g) / jnp.sqrt(ssd_z)
    # torch.clamp(q, lambda_max, inf)  == max(q, lambda_max)
    l_max = (jnp.maximum(q, lambda_max) - lambda_max) ** 2
    # torch.clamp(q, -inf, lambda_min) == min(q, lambda_min)
    l_min = (jnp.minimum(q, lambda_min) - lambda_min) ** 2
    return l_max + l_min


if __name__ == "__main__":
    key = jax.random.PRNGKey(0)
    k1, k2, k3, k4 = jax.random.split(key, 4)

    # gz / gz_prime: generator outputs (NCHW images); z / z_prime: latent codes.
    gz = jax.random.normal(k1, (2, 4, 16, 16), dtype=jnp.float32)
    gz_prime = gz + 0.1 * jax.random.normal(k2, (2, 4, 16, 16), dtype=jnp.float32)
    z = jax.random.normal(k3, (2, 32), dtype=jnp.float32)
    z_prime = z + 0.01 * jax.random.normal(k4, (2, 32), dtype=jnp.float32)

    loss = jacobian_clamping_loss(gz, gz_prime, z, z_prime)
    jax.block_until_ready(loss)

    # Pure-JAX reference check of the full forward.
    q_ref = jnp.linalg.norm(gz - gz_prime) / jnp.linalg.norm(z - z_prime)
    ref = (jnp.maximum(q_ref, LAMBDA_MAX) - LAMBDA_MAX) ** 2 + \
          (jnp.minimum(q_ref, LAMBDA_MIN) - LAMBDA_MIN) ** 2
    assert jnp.allclose(loss, ref, rtol=1e-5, atol=1e-5), (loss, ref)

    print("KERNEL_OK")
</pallas_src>

<mosaic_0001>
module attributes {stable_mosaic.version = 11 : i64} {
  func.func @_ssd_kernel(%arg0: i32, %arg1: i32, %arg2: memref<16x128xf32, #tpu.memory_space<vmem>>, %arg3: memref<16x128xf32, #tpu.memory_space<vmem>>, %arg4: memref<8x128xf32, #tpu.memory_space<vmem>>) attributes {dimension_semantics = [#tpu.dimension_semantics<parallel>, #tpu.dimension_semantics<arbitrary>], iteration_bounds = array<i64: 1, 1>, scalar_prefetch = 0 : i64, scratch_operands = 0 : i64, tpu.core_type = #tpu.core_type<tc>, window_params = [{transform_indices = @transform_0, window_bounds = array<i64: 16, 128>}, {transform_indices = @transform_1, window_bounds = array<i64: 16, 128>}, {transform_indices = @transform_2, window_bounds = array<i64: 8, 128>}]} {
    %c0_i32 = arith.constant 0 : i32
    %0 = arith.cmpi eq, %arg1, %c0_i32 : i32
    %1 = arith.extui %0 : i1 to i32
    %c0_i32_0 = arith.constant 0 : i32
    %2 = arith.cmpi ne, %1, %c0_i32_0 : i32
    scf.if %2 {
      %cst_8 = arith.constant 0.000000e+00 : f32
      %12 = vector.broadcast %cst_8 : f32 to vector<8x128xf32>
      %c0_9 = arith.constant 0 : index
      %c0_10 = arith.constant 0 : index
      %13 = vector.load %arg4[%c0_9, %c0_10] : memref<8x128xf32, #tpu.memory_space<vmem>>, vector<8x128xf32>
      tpu.vector_store %arg4[%c0_9, %c0_10], %12 {strides = array<i32>} : memref<8x128xf32, #tpu.memory_space<vmem>>, vector<8x128xf32>,
    } else {
    }
    %c0 = arith.constant 0 : index
    %c0_1 = arith.constant 0 : index
    %3 = vector.load %arg2[%c0, %c0_1] : memref<16x128xf32, #tpu.memory_space<vmem>>, vector<16x128xf32>
    %c0_2 = arith.constant 0 : index
    %c0_3 = arith.constant 0 : index
    %4 = vector.load %arg3[%c0_2, %c0_3] : memref<16x128xf32, #tpu.memory_space<vmem>>, vector<16x128xf32>
    %5 = arith.subf %3, %4 : vector<16x128xf32>
    %6 = arith.mulf %5, %5 : vector<16x128xf32>
    %c0_4 = arith.constant 0 : index
    %c0_5 = arith.constant 0 : index
    %7 = vector.load %arg4[%c0_4, %c0_5] : memref<8x128xf32, #tpu.memory_space<vmem>>, vector<8x128xf32>
    %8 = vector.shape_cast %6 : vector<16x128xf32> to vector<2x8x128xf32>
    %cst = arith.constant dense<0.000000e+00> : vector<8x128xf32>
    %9 = vector.multi_reduction <add>, %8, %cst [0] : vector<2x8x128xf32> to vector<8x128xf32>
    %10 = arith.addf %7, %9 : vector<8x128xf32>
    %c0_6 = arith.constant 0 : index
    %c0_7 = arith.constant 0 : index
    %11 = vector.load %arg4[%c0_6, %c0_7] : memref<8x128xf32, #tpu.memory_space<vmem>>, vector<8x128xf32>
    tpu.vector_store %arg4[%c0_6, %c0_7], %10 {strides = array<i32>} : memref<8x128xf32, #tpu.memory_space<vmem>>, vector<8x128xf32>,
    return
  }
  func.func @transform_0(%arg0: i32, %arg1: i32) -> (i32, i32) {
    %c1_i32 = arith.constant 1 : i32
    %0 = arith.muli %arg0, %c1_i32 : i32
    %1 = arith.addi %0, %arg1 : i32
    %c0_i32 = arith.constant 0 : i32
    %c0_i32_0 = arith.constant 0 : i32
    return %1, %c0_i32 : i32, i32
  }
  func.func @transform_1(%arg0: i32, %arg1: i32) -> (i32, i32) {
    %c1_i32 = arith.constant 1 : i32
    %0 = arith.muli %arg0, %c1_i32 : i32
    %1 = arith.addi %0, %arg1 : i32
    %c0_i32 = arith.constant 0 : i32
    %c0_i32_0 = arith.constant 0 : i32
    return %1, %c0_i32 : i32, i32
  }
  func.func @transform_2(%arg0: i32, %arg1: i32) -> (i32, i32) {
    %c0_i32 = arith.constant 0 : i32
    %c0_i32_0 = arith.constant 0 : i32
    return %arg0, %c0_i32 : i32, i32
  }
}

</mosaic_0001>

<bundles_post_ra>
// kernel: jacobian_clamping_loss.1
= control target key start
LH: loop header
LB: loop body
LE: loop exit
PB: predicated region body
PF: predicated region fallthrough
CT: control target
= control target key end

     0   :  { %s119_s0 = inlined_call_operand.vmem [shape: f32[16,128], index: 0, kind: input, shape index: {}]   ;;  %s120_s1 = inlined_call_operand.vmem [shape: f32[16,128], index: 1, kind: input, shape index: {}]   ;;  %s121_s2 = inlined_call_operand.vmem [shape: f32[8,128], index: 2, kind: output, shape index: {}]  }
   0x1   :  { %v60_v0 = vld [vmem:[%s119_s0] sm:$0xff]  ;;  %v61_v1 = vld [vmem:[%s119_s0 + $0x8] sm:$0xff] }
   0x2   :  { %v62_v2 = vld [vmem:[%s120_s1] sm:$0xff]  ;;  %v63_v3 = vld [vmem:[%s120_s1 + $0x8] sm:$0xff] }
   0x3   :  { %v64_v4 = vsub.f32 %v60_v0, %v62_v2  ;;  %v65_v5 = vsub.f32 %v61_v1, %v63_v3 }
   0x5   :  { %v66_v6 = vmul.f32 %v64_v4, %v64_v4  ;;  %v67_v7 = vmul.f32 %v65_v5, %v65_v5 }
   0x7   :  { %v69_v8 = vadd.f32 %v67_v7, %v66_v6 }
   0x9   :  { %71 = vst [vmem:[%s121_s2] sm:$0xff] %v69_v8 }

</bundles_post_ra>
